<compile_context>
chip_gen: v6e
topology: v6e:2x2x1
jax: 0.10.0
libtpu: 0.0.40
codegen_flags: <defaults>
</compile_context>

<pallas_src>
import functools

import jax
import jax.numpy as jnp
from jax.experimental import pallas as pl
from jax.experimental.pallas import tpu as pltpu

LANES = 128
F32_SUBLANES = 8
TARGET_TILE_BYTES = 4 << 20      # ~4 MiB of input per operand per grid step
MIN_SPLIT_TILE_BYTES = 1 << 20   # never shrink below ~1 MiB when chasing grid count


def _sublane_pack(dtype):
    # Min second-to-last-dim granularity for a non-full-dim block of this dtype.
    return {4: 8, 2: 16, 1: 32}.get(jnp.dtype(dtype).itemsize, 8)


def _partial_sumsq_kernel(o_ref, t_ref, psum_ref, *, rows, tile_rows, need_mask, fold):
    # o_ref, t_ref: (tile_rows, C) tiles in VMEM (native input dtype)
    # psum_ref:     (1, 1) f32 partial sum for this grid step (SMEM)
    d = o_ref[...].astype(jnp.float32) - t_ref[...].astype(jnp.float32)

    def reduce_and_store(dv):
        d2 = dv * dv
        if fold:
            # Fold sublane groups with pure VPU adds, leaving one small
            # (8, C)-shaped cross-lane reduce per multi-MiB tile.
            part = jnp.sum(d2.reshape(-1, F32_SUBLANES, d2.shape[-1]), axis=0)
            psum_ref[0, 0] = jnp.sum(part)
        else:
            psum_ref[0, 0] = jnp.sum(d2)

    if not need_mask:
        reduce_and_store(d)
    else:
        # Only the final grid step can own a partial row-tile; gate the mask
        # there so every other step is just load/sub/square/add.
        last = pl.num_programs(0) - 1

        @pl.when(pl.program_id(0) != last)
        def _():
            reduce_and_store(d)

        @pl.when(pl.program_id(0) == last)
        def _():
            valid_rows = rows - last * tile_rows
            row_idx = jax.lax.broadcasted_iota(jnp.int32, d.shape, 0)
            reduce_and_store(jnp.where(row_idx < valid_rows, d, jnp.float32(0.0)))


def _choose_tile_rows(rows, row_bytes, sub):
    budget_rows = max(sub, (TARGET_TILE_BYTES // row_bytes) // sub * sub)
    if rows <= budget_rows:
        return rows  # single full-dim block: always a legal block shape
    tile_rows = budget_rows
    # Keep >= ~8 grid steps on big inputs so the "parallel" axis can be split
    # across v7x's two TensorCores, without dropping below ~1 MiB per step.
    while (pl.cdiv(rows, tile_rows) < 8 and tile_rows > sub
           and (tile_rows // 2) * row_bytes >= MIN_SPLIT_TILE_BYTES):
        tile_rows = max(sub, (tile_rows // 2) // sub * sub)
    return tile_rows


def _partial_sumsq_2d(o2, t2):
    """sum((o2 - t2)^2) over a 2-D array via a tiled Pallas reduction (f32)."""
    rows, cols = o2.shape
    c_pad = pl.cdiv(cols, LANES) * LANES
    itemsize = max(o2.dtype.itemsize, t2.dtype.itemsize)
    sub = max(_sublane_pack(o2.dtype), _sublane_pack(t2.dtype))

    tile_rows = _choose_tile_rows(rows, c_pad * itemsize, sub)
    num_tiles = pl.cdiv(rows, tile_rows)
    need_mask = (rows % tile_rows) != 0
    fold = (tile_rows % F32_SUBLANES) == 0

    # 2 operands x 2 pipeline buffers of native-dtype tiles, plus headroom.
    buf_bytes = 2 * tile_rows * c_pad * (o2.dtype.itemsize + t2.dtype.itemsize)
    vmem_limit = int(min(64 << 20, max(32 << 20, buf_bytes + (8 << 20))))

    n_elem = rows * cols
    cost = pl.CostEstimate(
        flops=3 * n_elem,
        transcendentals=0,
        bytes_accessed=n_elem * (o2.dtype.itemsize + t2.dtype.itemsize) + num_tiles * 4,
    )

    partials = pl.pallas_call(
        functools.partial(
            _partial_sumsq_kernel,
            rows=rows,
            tile_rows=tile_rows,
            need_mask=need_mask,
            fold=fold,
        ),
        out_shape=jax.ShapeDtypeStruct((num_tiles, 1), jnp.float32),
        grid_spec=pltpu.PrefetchScalarGridSpec(
            num_scalar_prefetch=0,
            grid=(num_tiles,),
            in_specs=[
                pl.BlockSpec((tile_rows, cols), lambda i: (i, 0)),
                pl.BlockSpec((tile_rows, cols), lambda i: (i, 0)),
            ],
            out_specs=pl.BlockSpec(
                (1, 1), lambda i: (i, 0), memory_space=pltpu.SMEM
            ),
        ),
        compiler_params=pltpu.CompilerParams(
            dimension_semantics=("parallel",),
            vmem_limit_bytes=vmem_limit,
        ),
        cost_estimate=cost,
    )(o2, t2)

    return jnp.sum(partials)


def rms_error(output, target):
    """Pallas equivalent of torch.sqrt(torch.mean((output - target) ** 2))."""
    assert output.shape == target.shape
    n_elem = output.size
    itemsize = max(output.dtype.itemsize, target.dtype.itemsize)

    if n_elem % LANES == 0:
        # Lane-aligned total size: free reshape to a dense (rows, 128) view.
        o2 = output.reshape(n_elem // LANES, LANES)
        t2 = target.reshape(n_elem // LANES, LANES)
        total = _partial_sumsq_2d(o2, t2)
    elif (output.ndim >= 2
          and pl.cdiv(output.shape[-1], LANES) * LANES * itemsize <= TARGET_TILE_BYTES):
        # Ragged total size but a usable trailing dim: collapse the leading
        # dims (free for contiguous arrays); Mosaic masks the <128-lane row
        # tail in-kernel.  No padded copy of the inputs is ever made.
        cols = output.shape[-1]
        o2 = output.reshape(n_elem // cols, cols)
        t2 = target.reshape(n_elem // cols, cols)
        total = _partial_sumsq_2d(o2, t2)
    else:
        # Degenerate 1-D ragged (or oversized trailing dim): kernel-process the
        # lane-aligned prefix, fold the <128-element tail in plain JAX.
        # TODO(synk): the prefix slice still copies once in HBM; a fully
        # copy-free path here would need a 1-D BlockSpec with flat masking.
        o_f = output.reshape(-1)
        t_f = target.reshape(-1)
        n_main = (n_elem // LANES) * LANES
        if n_main == n_elem:
            tail = jnp.float32(0.0)
        else:
            tail = jnp.sum(
                (o_f[n_main:].astype(jnp.float32)
                 - t_f[n_main:].astype(jnp.float32)) ** 2)
        if n_main == 0:
            total = tail
        else:
            o2 = o_f[:n_main].reshape(n_main // LANES, LANES)
            t2 = t_f[:n_main].reshape(n_main // LANES, LANES)
            total = _partial_sumsq_2d(o2, t2) + tail

    return jnp.sqrt(total / jnp.float32(n_elem))


if __name__ == "__main__":
    key = jax.random.PRNGKey(0)
    k_out, k_tgt, k2_out, k2_tgt = jax.random.split(key, 4)

    # Main example: small NCHW-shaped inputs (module is shape-agnostic).
    shape = (2, 4, 16, 16)
    output = jax.random.normal(k_out, shape, dtype=jnp.float32)
    target = jax.random.normal(k_tgt, shape, dtype=jnp.float32)

    result = rms_error(output, target)
    jax.block_until_ready(result)
    ref = jnp.sqrt(jnp.mean((output - target) ** 2))
    assert jnp.allclose(result, ref, rtol=1e-5, atol=1e-6), (result, ref)

    # Second check: ragged shape exercising the copy-free full-last-dim path.
    shape2 = (5, 300)  # 1500 elements -> not lane-aligned
    output2 = jax.random.normal(k2_out, shape2, dtype=jnp.float32)
    target2 = jax.random.normal(k2_tgt, shape2, dtype=jnp.float32)
    result2 = rms_error(output2, target2)
    jax.block_until_ready(result2)
    ref2 = jnp.sqrt(jnp.mean((output2 - target2) ** 2))
    assert jnp.allclose(result2, ref2, rtol=1e-5, atol=1e-6), (result2, ref2)

    print("KERNEL_OK")
</pallas_src>

<mosaic_0001>
module attributes {stable_mosaic.version = 11 : i64} {
  func.func @_partial_sumsq_kernel(%arg0: i32, %arg1: memref<16x128xf32, #tpu.memory_space<vmem>>, %arg2: memref<16x128xf32, #tpu.memory_space<vmem>>, %arg3: memref<1x1xf32, #tpu.memory_space<smem>>) attributes {dimension_semantics = [#tpu.dimension_semantics<parallel>], iteration_bounds = array<i64: 1>, scalar_prefetch = 0 : i64, scratch_operands = 0 : i64, tpu.core_type = #tpu.core_type<tc>, window_params = [{transform_indices = @transform_0, window_bounds = array<i64: 16, 128>}, {transform_indices = @transform_1, window_bounds = array<i64: 16, 128>}, {transform_indices = @transform_2, window_bounds = array<i64: 1, 1>}]} {
    %c0 = arith.constant 0 : index
    %c0_0 = arith.constant 0 : index
    %0 = vector.load %arg1[%c0, %c0_0] : memref<16x128xf32, #tpu.memory_space<vmem>>, vector<16x128xf32>
    %c0_1 = arith.constant 0 : index
    %c0_2 = arith.constant 0 : index
    %1 = vector.load %arg2[%c0_1, %c0_2] : memref<16x128xf32, #tpu.memory_space<vmem>>, vector<16x128xf32>
    %2 = arith.subf %0, %1 : vector<16x128xf32>
    %3 = arith.mulf %2, %2 : vector<16x128xf32>
    %4 = vector.shape_cast %3 : vector<16x128xf32> to vector<2x8x128xf32>
    %cst = arith.constant dense<0.000000e+00> : vector<8x128xf32>
    %5 = vector.multi_reduction <add>, %4, %cst [0] : vector<2x8x128xf32> to vector<8x128xf32>
    %6 = vector.shape_cast %5 : vector<8x128xf32> to vector<1x8x128xf32>
    %cst_3 = arith.constant dense<0.000000e+00> : vector<1xf32>
    %7 = vector.multi_reduction <add>, %6, %cst_3 [1, 2] : vector<1x8x128xf32> to vector<1xf32>
    %8 = vector.shape_cast %7 : vector<1xf32> to vector<1x1x1xf32>
    %9 = vector.extract %8[0, 0, 0] : f32 from vector<1x1x1xf32>
    %c0_4 = arith.constant 0 : index
    %c0_5 = arith.constant 0 : index
    %10 = memref.load %arg3[%c0_4, %c0_5] : memref<1x1xf32, #tpu.memory_space<smem>>
    memref.store %9, %arg3[%c0_4, %c0_5] : memref<1x1xf32, #tpu.memory_space<smem>>
    return
  }
  func.func @transform_0(%arg0: i32) -> (i32, i32) {
    %c0_i32 = arith.constant 0 : i32
    %c0_i32_0 = arith.constant 0 : i32
    return %arg0, %c0_i32 : i32, i32
  }
  func.func @transform_1(%arg0: i32) -> (i32, i32) {
    %c0_i32 = arith.constant 0 : i32
    %c0_i32_0 = arith.constant 0 : i32
    return %arg0, %c0_i32 : i32, i32
  }
  func.func @transform_2(%arg0: i32) -> (i32, i32) {
    %c0_i32 = arith.constant 0 : i32
    %c0_i32_0 = arith.constant 0 : i32
    return %arg0, %c0_i32 : i32, i32
  }
}

</mosaic_0001>

<bundles_post_ra>
// kernel: tpu_custom_call.1
= control target key start
LH: loop header
LB: loop body
LE: loop exit
PB: predicated region body
PF: predicated region fallthrough
CT: control target
= control target key end

     0   :  { %7 = vsyncpa [#allocation3], 0  ;;  %s165_s0 = inlined_call_operand.hbm [shape: f32[16,128], index: 0, kind: input, shape index: {}]   ;;  %s166_s1 = inlined_call_operand.hbm [shape: f32[16,128], index: 1, kind: input, shape index: {}]   ;;  %s167_s2 = inlined_call_operand.hbm [shape: f32[1,1], index: 2, kind: output, shape index: {}]  }
   0x1   :  { %8 = vsyncpa [#allocation6], 0 }
   0x2   :  { %9 = vsyncpa [#allocation4], 0  ;;  %s136_s9 = smov [#allocation2]  }
   0x3   :  { %s15_s10 = sshll.u32 %s136_s9, 4  ;;  %s16_s10 = int_to_ptr.vmem [resolvable:$true] %s15_s10 }
   0x4   :  { %s90_s11 = scalar_lea.vmem %s16_s10, 256  ;;  %p95_p1 = scmp.lt.s32.totalorder %s16_s10, %s16_s10 }
   0x5   :  { %p91_p0 = scmp.ne.s32.totalorder %s16_s10, %s90_s11  ;;  %p96_p2 = scmp.lt.s32.totalorder %s90_s11, %s90_s11 }
   0x7   :  { %p97_p3 = por %p96_p2, %p95_p1 }
   0x9   :  { %p98_p4 = pnand %p97_p3, %p91_p0 }
   0xb   :  { %101 = shalt.err (!%p98_p4)
}
   0xc   :  { %s137_s12 = smov 128   ;;  %s138_s13 = smov 8  }
   0xd   :  { %21 = dma.hbm_to_vmem [thread:$0]  %s165_s0, 256, %s16_s10, [#allocation3], %s137_s12, %s137_s12, %s138_s13  }
   0xe   :  { %s139_s16 = smov [#allocation5]  }
   0xf   :  { %s27_s17 = sshll.u32 %s139_s16, 4  ;;  %s28_s17 = int_to_ptr.vmem [resolvable:$true] %s27_s17 }
  0x10   :  { %s110_s18 = scalar_lea.vmem %s28_s17, 256  ;;  %p115_p6 = scmp.lt.s32.totalorder %s28_s17, %s28_s17 }
  0x11   :  { %p111_p5 = scmp.ne.s32.totalorder %s28_s17, %s110_s18  ;;  %p116_p7 = scmp.lt.s32.totalorder %s110_s18, %s110_s18 }
  0x13   :  { %p117_p8 = por %p116_p7, %p115_p6 }
  0x15   :  { %p118_p9 = pnand %p117_p8, %p111_p5 }
  0x17   :  { %121 = shalt.err (!%p118_p9)
}
  0x18   :  { %33 = dma.hbm_to_vmem [thread:$0]  %s166_s1, 256, %s28_s17, [#allocation6], %s137_s12, %s137_s12, %s138_s13  }
  0x19   :  { %130 = dma.done.wait [#allocation3], 256  }
  0x1a   :  { %131 = vsyncadd [#allocation3], 4294967040 }
  0x1b   :  { %132 = dma.done.wait [#allocation6], 256  }
  0x1c   :  { %133 = vsyncadd [#allocation6], 4294967040  ;;  %v40_v0 = vld [vmem:[#allocation2] sm:$0xff]  ;;  %v41_v1 = vld [vmem:[#allocation2 + $0x8] sm:$0xff]  ;;  %s140_s1 = smov [#allocation7]  }
  0x1d   :  { %v42_v2 = vld [vmem:[#allocation5] sm:$0xff]  ;;  %v43_v3 = vld [vmem:[#allocation5 + $0x8] sm:$0xff] }
  0x1e   :  { %v44_v4 = vsub.f32 %v40_v0, %v42_v2  ;;  %v45_v5 = vsub.f32 %v41_v1, %v43_v3 }
  0x20   :  { %v46_v6 = vmul.f32 %v44_v4, %v44_v4  ;;  %v47_v7 = vmul.f32 %v45_v5, %v45_v5 }
  0x22   :  { %v48_v8 = vadd.f32 %v47_v7, %v46_v6 }
  0x24   :  { %49 = vadd.xlane.f32.xlu0 %v48_v8 }
  0xad   :  { %v50_v9 = vpop.xlane.xlu0 %49 }
  0xae   :  { %v51_v10 = vrot.slane %v50_v9, 4 }
  0xb0   :  { %v52_v11 = vadd.f32 %v51_v10, %v50_v9 }
  0xb2   :  { %v53_v12 = vrot.slane %v52_v11, 2 }
  0xb4   :  { %v54_v13 = vadd.f32 %v53_v12, %v52_v11 }
  0xb6   :  { %v55_v14 = vrot.slane %v54_v13, 1 }
  0xb8   :  { %v56_v15 = vadd.f32 %v55_v14, %v54_v13 }
  0xba   :  { %75 = vpush %v56_v15 }
  0xeb   :  { %s76_s0 = spop %75 }
  0xec   :  { %59 = sst [smem:[#allocation7]] %s76_s0 }
  0xed   :  { %67 = dma.smem_to_hbm %s140_s1, 16, %s167_s2, [#allocation4]  }
  0xee   :  { %134 = dma.done.wait [#allocation4], 16  }
  0xef   :  { %135 = vsyncadd [#allocation4], 4294967280 }
  0xf0   :  { %71 = sfence }
  0xf1   :  { %72 = vsyncpa [#allocation3], 1 }
  0xf2   :  { %73 = vsyncpa [#allocation6], 1 }
  0xf3   :  { %74 = vsyncpa [#allocation4], 1 }

</bundles_post_ra>
